<compile_context>
chip_gen: v5e
topology: v5e:2x2
jax: 0.10.0
libtpu: 0.0.40
codegen_flags: <defaults>
</compile_context>

<pallas_src>
import jax
import jax.numpy as jnp
from jax.experimental import pallas as pl
from jax.experimental.pallas import tpu as pltpu


def _round_up(a, b):
    return (a + b - 1) // b * b


def flux_kernel(x_ref, scale_ref, w1_ref, w2_ref, b2_ref, cmt_ref, out_ref):
    """One batch tile.
    x_ref     : (TILE_B, n_modules*n_genes)
    scale_ref : (TILE_B, 1)                 -- scale[cell_id], gathered in wrapper
    w1_ref    : (n_modules*n_genes, n_modules*hidden)   block-diagonal
    w2_ref    : (n_modules*hidden, n_modules)           block-diagonal
    b2_ref    : (1, n_modules)
    cmt_ref   : (n_modules, n_comps)                    cmMat.T
    out_ref   : (TILE_B, n_modules + n_comps)           [m | c]
    """
    x = x_ref[...]

    # layer 1 of every module at once (block-diagonal weights)
    h = jnp.dot(x, w1_ref[...], preferred_element_type=jnp.float32)
    h = h - jnp.tanh(h)                                   # Tanhshrink

    # layer 2 of every module at once
    y = jnp.dot(h, w2_ref[...], preferred_element_type=jnp.float32) + b2_ref[...]
    y = y - jnp.tanh(y)                                   # Tanhshrink

    # scale_m: |m| * scale[cell_id]  (gather already done host-side)
    m = jnp.abs(y) * scale_ref[...]

    # updateC: c = m @ cmMat.T
    c = jnp.dot(m, cmt_ref[...], preferred_element_type=jnp.float32)

    # single lane-contiguous write; wrapper splits it back into (m, c)
    out_ref[...] = jnp.concatenate([m, c], axis=1).astype(out_ref.dtype)


def flux_forward(x, w1, w2, b2, cell_id, scale, cmMat, *, tile_b=512):
    """x: (B, n_modules*n_genes); w1: (n_modules, n_genes, hidden);
    w2: (n_modules, hidden); b2: (n_modules,); cell_id: (B,) int;
    scale: (n_cells,); cmMat: (n_comps, n_modules). Returns (m, c)."""
    B = x.shape[0]
    n_modules, n_genes, hidden = w1.shape
    n_comps = cmMat.shape[0]
    F_in = n_modules * n_genes
    H = n_modules * hidden

    # --- parameter packing (trace-time glue) -------------------------------
    # Block-diagonal layer-1 / layer-2 weights so the kernel does two wide matmuls.
    w1_bd = jnp.zeros((F_in, H), jnp.float32)
    w2_bd = jnp.zeros((H, n_modules), jnp.float32)
    for i in range(n_modules):
        w1_bd = w1_bd.at[i * n_genes:(i + 1) * n_genes,
                         i * hidden:(i + 1) * hidden].set(w1[i].astype(jnp.float32))
        w2_bd = w2_bd.at[i * hidden:(i + 1) * hidden, i].set(w2[i].astype(jnp.float32))
    b2_row = b2.reshape(1, n_modules).astype(jnp.float32)
    cmt = jnp.transpose(cmMat).astype(jnp.float32)          # (n_modules, n_comps)

    # scale gather hoisted out of the kernel: one cheap XLA gather
    scale_row = scale[cell_id].reshape(B, 1).astype(jnp.float32)

    # --- batch tiling ------------------------------------------------------
    tile_b = max(8, min(tile_b, _round_up(B, 8)))           # sublane multiple of 8
    B_pad = _round_up(B, tile_b)
    x_f32 = x.astype(jnp.float32)
    if B_pad != B:
        x_f32 = jnp.pad(x_f32, ((0, B_pad - B), (0, 0)))
        scale_row = jnp.pad(scale_row, ((0, B_pad - B), (0, 0)))
    grid = (B_pad // tile_b,)

    n_out = n_modules + n_comps
    out = pl.pallas_call(
        flux_kernel,
        out_shape=jax.ShapeDtypeStruct((B_pad, n_out), jnp.float32),
        grid=grid,
        in_specs=[
            pl.BlockSpec((tile_b, F_in), lambda i: (i, 0)),        # x streams
            pl.BlockSpec((tile_b, 1), lambda i: (i, 0)),           # scale streams
            pl.BlockSpec((F_in, H), lambda i: (0, 0)),             # weights resident
            pl.BlockSpec((H, n_modules), lambda i: (0, 0)),
            pl.BlockSpec((1, n_modules), lambda i: (0, 0)),
            pl.BlockSpec((n_modules, n_comps), lambda i: (0, 0)),
        ],
        out_specs=pl.BlockSpec((tile_b, n_out), lambda i: (i, 0)),
        compiler_params=pltpu.CompilerParams(
            dimension_semantics=("parallel",),                     # megacore on v7x
            vmem_limit_bytes=32 * 1024 * 1024,
        ),
    )(x_f32, scale_row, w1_bd, w2_bd, b2_row, cmt)

    m = out[:B, :n_modules]
    c = out[:B, n_modules:]
    return m, c


def _reference(x, w1, w2, b2, cell_id, scale, cmMat, n_modules, n_genes):
    # pure-JAX reference mirroring the PyTorch forward exactly
    cols = []
    for i in range(n_modules):
        xb = x[:, i * n_genes:(i + 1) * n_genes]
        h = xb @ w1[i]
        h = h - jnp.tanh(h)
        y = h @ w2[i][:, None] + b2[i]
        y = y - jnp.tanh(y)
        cols.append(y)
    m0 = jnp.concatenate(cols, axis=1)
    ms = jnp.abs(m0) * scale[cell_id][:, None]
    return ms, ms @ cmMat.T


if __name__ == "__main__":
    # small shapes consistent with the module (f_in == n_genes, hidden=8, f_out=1)
    n_modules, n_genes, hidden = 8, 32, 8
    n_comps, n_cells = 16, 10

    key = jax.random.PRNGKey(0)
    ks = jax.random.split(key, 7)
    w1 = jax.random.normal(ks[1], (n_modules, n_genes, hidden), jnp.float32) * 0.1
    w2 = jax.random.normal(ks[2], (n_modules, hidden), jnp.float32) * 0.1
    b2 = jax.random.normal(ks[3], (n_modules,), jnp.float32) * 0.1
    cmMat = jax.random.normal(ks[4], (n_comps, n_modules), jnp.float32)
    scale = jax.random.uniform(ks[5], (n_cells,), jnp.float32, 0.5, 1.5)

    ok = True
    for B in (8, 13):  # 13 exercises the batch-padding path
        kx, kc = jax.random.split(jax.random.fold_in(ks[0], B))
        x = jax.random.normal(kx, (B, n_modules * n_genes), jnp.float32)
        cell_id = jax.random.randint(kc, (B,), 0, n_cells)

        m, c = flux_forward(x, w1, w2, b2, cell_id, scale, cmMat)
        jax.block_until_ready((m, c))

        mr, cr = _reference(x, w1, w2, b2, cell_id, scale, cmMat, n_modules, n_genes)
        ok &= bool(jnp.allclose(m, mr, atol=1e-5, rtol=1e-5))
        ok &= bool(jnp.allclose(c, cr, atol=1e-4, rtol=1e-4))

    assert ok, "mismatch vs reference"
    print("KERNEL_OK")
</pallas_src>

<mosaic_0001>
module attributes {stable_mosaic.version = 11 : i64} {
  func.func @flux_kernel(%arg0: i32, %arg1: memref<8x256xf32, #tpu.memory_space<vmem>>, %arg2: memref<8x1xf32, #tpu.memory_space<vmem>>, %arg3: memref<256x64xf32, #tpu.memory_space<vmem>>, %arg4: memref<64x8xf32, #tpu.memory_space<vmem>>, %arg5: memref<1x8xf32, #tpu.memory_space<vmem>>, %arg6: memref<8x16xf32, #tpu.memory_space<vmem>>, %arg7: memref<8x24xf32, #tpu.memory_space<vmem>>) attributes {dimension_semantics = [#tpu.dimension_semantics<parallel>], iteration_bounds = array<i64: 1>, scalar_prefetch = 0 : i64, scratch_operands = 0 : i64, tpu.core_type = #tpu.core_type<tc>, window_params = [{transform_indices = @transform_0, window_bounds = array<i64: 8, 256>}, {transform_indices = @transform_1, window_bounds = array<i64: 8, 1>}, {pipeline_mode = #tpu.pipeline_mode<synchronous>, transform_indices = @transform_2, window_bounds = array<i64: 256, 64>}, {pipeline_mode = #tpu.pipeline_mode<synchronous>, transform_indices = @transform_3, window_bounds = array<i64: 64, 8>}, {pipeline_mode = #tpu.pipeline_mode<synchronous>, transform_indices = @transform_4, window_bounds = array<i64: 1, 8>}, {pipeline_mode = #tpu.pipeline_mode<synchronous>, transform_indices = @transform_5, window_bounds = array<i64: 8, 16>}, {transform_indices = @transform_6, window_bounds = array<i64: 8, 24>}]} {
    %c0 = arith.constant 0 : index
    %c0_0 = arith.constant 0 : index
    %0 = vector.load %arg1[%c0, %c0_0] : memref<8x256xf32, #tpu.memory_space<vmem>>, vector<8x256xf32>
    %c0_1 = arith.constant 0 : index
    %c0_2 = arith.constant 0 : index
    %1 = vector.load %arg3[%c0_1, %c0_2] : memref<256x64xf32, #tpu.memory_space<vmem>>, vector<256x64xf32>
    %cst = arith.constant dense<0.000000e+00> : vector<8x64xf32>
    %2 = tpu.matmul %0, %1, %cst {dimension_numbers = #tpu.dot_dimension_numbers<[1], [0], [0], [1], [0, 0, 1, 1], [], []>} : vector<8x256xf32>, vector<256x64xf32>, vector<8x64xf32> -> vector<8x64xf32>
    %3 = math.tanh %2 : vector<8x64xf32>
    %4 = arith.subf %2, %3 : vector<8x64xf32>
    %c0_3 = arith.constant 0 : index
    %c0_4 = arith.constant 0 : index
    %5 = vector.load %arg4[%c0_3, %c0_4] : memref<64x8xf32, #tpu.memory_space<vmem>>, vector<64x8xf32>
    %cst_5 = arith.constant dense<0.000000e+00> : vector<8x8xf32>
    %6 = tpu.matmul %4, %5, %cst_5 {dimension_numbers = #tpu.dot_dimension_numbers<[1], [0], [0], [1], [0, 0, 1, 1], [], []>} : vector<8x64xf32>, vector<64x8xf32>, vector<8x8xf32> -> vector<8x8xf32>
    %c0_6 = arith.constant 0 : index
    %c0_7 = arith.constant 0 : index
    %7 = vector.load %arg5[%c0_6, %c0_7] : memref<1x8xf32, #tpu.memory_space<vmem>>, vector<1x8xf32>
    %8 = vector.broadcast %7 : vector<1x8xf32> to vector<8x8xf32>
    %9 = arith.addf %6, %8 : vector<8x8xf32>
    %10 = math.tanh %9 : vector<8x8xf32>
    %11 = arith.subf %9, %10 : vector<8x8xf32>
    %12 = math.absf %11 : vector<8x8xf32>
    %c0_8 = arith.constant 0 : index
    %c0_9 = arith.constant 0 : index
    %13 = vector.load %arg2[%c0_8, %c0_9] : memref<8x1xf32, #tpu.memory_space<vmem>>, vector<8x1xf32>
    %14 = vector.broadcast %13 : vector<8x1xf32> to vector<8x8xf32>
    %15 = arith.mulf %12, %14 : vector<8x8xf32>
    %c0_10 = arith.constant 0 : index
    %c0_11 = arith.constant 0 : index
    %16 = vector.load %arg6[%c0_10, %c0_11] : memref<8x16xf32, #tpu.memory_space<vmem>>, vector<8x16xf32>
    %cst_12 = arith.constant dense<0.000000e+00> : vector<8x16xf32>
    %17 = tpu.matmul %15, %16, %cst_12 {dimension_numbers = #tpu.dot_dimension_numbers<[1], [0], [0], [1], [0, 0, 1, 1], [], []>} : vector<8x8xf32>, vector<8x16xf32>, vector<8x16xf32> -> vector<8x16xf32>
    %18 = tpu.concatenate %15, %17 in 1 : vector<8x8xf32>, vector<8x16xf32> -> vector<8x24xf32>
    %c0_13 = arith.constant 0 : index
    %c0_14 = arith.constant 0 : index
    %19 = vector.load %arg7[%c0_13, %c0_14] : memref<8x24xf32, #tpu.memory_space<vmem>>, vector<8x24xf32>
    tpu.vector_store %arg7[%c0_13, %c0_14], %18 {strides = array<i32>} : memref<8x24xf32, #tpu.memory_space<vmem>>, vector<8x24xf32>,
    return
  }
  func.func @transform_0(%arg0: i32) -> (i32, i32) {
    %c0_i32 = arith.constant 0 : i32
    %c0_i32_0 = arith.constant 0 : i32
    return %arg0, %c0_i32 : i32, i32
  }
  func.func @transform_1(%arg0: i32) -> (i32, i32) {
    %c0_i32 = arith.constant 0 : i32
    %c0_i32_0 = arith.constant 0 : i32
    return %arg0, %c0_i32 : i32, i32
  }
  func.func @transform_2(%arg0: i32) -> (i32, i32) {
    %c0_i32 = arith.constant 0 : i32
    %c0_i32_0 = arith.constant 0 : i32
    %c0_i32_1 = arith.constant 0 : i32
    return %c0_i32, %c0_i32_0 : i32, i32
  }
  func.func @transform_3(%arg0: i32) -> (i32, i32) {
    %c0_i32 = arith.constant 0 : i32
    %c0_i32_0 = arith.constant 0 : i32
    %c0_i32_1 = arith.constant 0 : i32
    return %c0_i32, %c0_i32_0 : i32, i32
  }
  func.func @transform_4(%arg0: i32) -> (i32, i32) {
    %c0_i32 = arith.constant 0 : i32
    %c0_i32_0 = arith.constant 0 : i32
    %c0_i32_1 = arith.constant 0 : i32
    return %c0_i32, %c0_i32_0 : i32, i32
  }
  func.func @transform_5(%arg0: i32) -> (i32, i32) {
    %c0_i32 = arith.constant 0 : i32
    %c0_i32_0 = arith.constant 0 : i32
    %c0_i32_1 = arith.constant 0 : i32
    return %c0_i32, %c0_i32_0 : i32, i32
  }
  func.func @transform_6(%arg0: i32) -> (i32, i32) {
    %c0_i32 = arith.constant 0 : i32
    %c0_i32_0 = arith.constant 0 : i32
    return %arg0, %c0_i32 : i32, i32
  }
}

</mosaic_0001>

<bundles_post_ra>
// kernel: tpu_custom_call.1
= control target key start
LH: loop header
LB: loop body
LE: loop exit
PB: predicated region body
PF: predicated region fallthrough
CT: control target
= control target key end

     0   :  { %s407_s0 = inlined_call_operand.vmem [shape: f32[8,256], index: 0, kind: input, shape index: {}]   ;;  %s408_s1 = inlined_call_operand.vmem [shape: f32[8,1], index: 1, kind: input, shape index: {}]   ;;  %s409_s2 = inlined_call_operand.vmem [shape: f32[256,64], index: 2, kind: input, shape index: {}]   ;;  %s410_s3 = inlined_call_operand.vmem [shape: f32[64,8], index: 3, kind: input, shape index: {}]   ;;  %s411_s4 = inlined_call_operand.vmem [shape: f32[1,8], index: 4, kind: input, shape index: {}]   ;;  %s412_s5 = inlined_call_operand.vmem [shape: f32[8,16], index: 5, kind: input, shape index: {}]   ;;  %s413_s6 = inlined_call_operand.hbm [shape: f32[8,24], index: 6, kind: output, shape index: {}]  }
   0x1   :  { %v41_v0 = vld [vmem:[%s409_s2 + $0x78] sm:$0xff]  ;;  %v40_v2 = vld [vmem:[%s409_s2 + $0x70] sm:$0xff]  ;;  %v39_v4 = vld [vmem:[%s409_s2 + $0x68] sm:$0xff] }
   0x2   :  { %v57_v1 = vld [vmem:[%s409_s2 + $0xf8] sm:$0xff]  ;;  %58 = vmatpush.msra.mxu0 %v41_v0  ;;  %v56_v3 = vld [vmem:[%s409_s2 + $0xf0] sm:$0xff]  ;;  %v55_v5 = vld [vmem:[%s409_s2 + $0xe8] sm:$0xff] }
   0x3   :  { %78 = vmatpush.msra.mxu1 %v57_v1  ;;  %v38_v6 = vld [vmem:[%s409_s2 + $0x60] sm:$0xff]  ;;  %v37_v8 = vld [vmem:[%s409_s2 + $0x58] sm:$0xff]  ;;  %v36_v10 = vld [vmem:[%s409_s2 + $0x50] sm:$0xff] }
   0x4   :  { %59 = vmatpush.msra.mxu0 %v40_v2  ;;  %v54_v7 = vld [vmem:[%s409_s2 + $0xe0] sm:$0xff]  ;;  %v53_v9 = vld [vmem:[%s409_s2 + $0xd8] sm:$0xff]  ;;  %v52_v11 = vld [vmem:[%s409_s2 + $0xd0] sm:$0xff] }
   0x5   :  { %79 = vmatpush.msra.mxu1 %v56_v3  ;;  %v35_v12 = vld [vmem:[%s409_s2 + $0x48] sm:$0xff]  ;;  %v34_v14 = vld [vmem:[%s409_s2 + $0x40] sm:$0xff]  ;;  %v107_v15 = vld [vmem:[%s410_s3 + $0x38] sm:$0xff] }
   0x6   :  { %60 = vmatpush.msra.mxu0 %v39_v4  ;;  %v51_v13 = vld [vmem:[%s409_s2 + $0xc8] sm:$0xff]  ;;  %v106_v16 = vld [vmem:[%s410_s3 + $0x30] sm:$0xff]  ;;  %v50_v17 = vld [vmem:[%s409_s2 + $0xc0] sm:$0xff]  ;;  %124 = vmatpush.msra.mxu2 %v107_v15 }
   0x7   :  { %80 = vmatpush.msra.mxu1 %v55_v5 }
   0x8   :  { %61 = vmatpush.msra.mxu0 %v38_v6 }
   0x9   :  { %81 = vmatpush.msra.mxu1 %v54_v7 }
   0xa   :  { %62 = vmatpush.msra.mxu0 %v37_v8 }
   0xb   :  { %82 = vmatpush.msra.mxu1 %v53_v9 }
   0xc   :  { %63 = vmatpush.msra.mxu0 %v36_v10 }
   0xd   :  { %83 = vmatpush.msra.mxu1 %v52_v11 }
   0xe   :  { %11 = vsyncpa [#allocation3], 0  ;;  %64 = vmatpush.msra.mxu0 %v35_v12  ;;  %v33_v18 = vld [vmem:[%s409_s2 + $0x38] sm:$0xff]  ;;  %125 = vmatpush.msra.mxu2 %v106_v16  ;;  %v32_v20 = vld [vmem:[%s409_s2 + $0x30] sm:$0xff]  ;;  %v231_v43 = vmov 0   ;;  %vm112_vm0 = vcmask 523264  }
   0xf   :  { %84 = vmatpush.msra.mxu1 %v51_v13  ;;  %v49_v19 = vld [vmem:[%s409_s2 + $0xb8] sm:$0xff]  ;;  %v48_v21 = vld [vmem:[%s409_s2 + $0xb0] sm:$0xff]  ;;  %v31_v22 = vld [vmem:[%s409_s2 + $0x28] sm:$0xff]  ;;  %199 = vset.pattern.permute.xlu0 %v231_v43  ;;  %vm147_vm1 = vcmask 64512   ;;  %s233_s12 = smov [#allocation2]   ;;  %s185_s15 = sshll.u32 %s413_s6, 4  ;;  %s186_s15 = int_to_ptr.hbm [resolvable:$true] %s185_s15 }
  0x10   :  { %65 = vmatpush.msra.mxu0 %v34_v14  ;;  %v47_v23 = vld [vmem:[%s409_s2 + $0xa8] sm:$0xff]  ;;  %v30_v24 = vld [vmem:[%s409_s2 + $0x20] sm:$0xff]  ;;  %v29_v26 = vld [vmem:[%s409_s2 + $0x18] sm:$0xff]  ;;  %vm176_vm2 = vcmask 195584  }
  0x11   :  { %85 = vmatpush.msra.mxu1 %v50_v17  ;;  %v46_v25 = vld [vmem:[%s409_s2 + $0xa0] sm:$0xff]  ;;  %v45_v27 = vld [vmem:[%s409_s2 + $0x98] sm:$0xff]  ;;  %v28_v28 = vld [vmem:[%s409_s2 + $0x10] sm:$0xff] }
  0x12   :  { %66 = vmatpush.msra.mxu0 %v33_v18  ;;  %v44_v29 = vld [vmem:[%s409_s2 + $0x90] sm:$0xff]  ;;  %v27_v30 = vld [vmem:[%s409_s2 + $0x8] sm:$0xff]  ;;  %v26_v32 = vld [vmem:[%s409_s2] sm:$0xff] }
  0x13   :  { %86 = vmatpush.msra.mxu1 %v49_v19  ;;  %v43_v31 = vld [vmem:[%s409_s2 + $0x88] sm:$0xff]  ;;  %v42_v33 = vld [vmem:[%s409_s2 + $0x80] sm:$0xff]  ;;  %v103_v38 = vld [vmem:[%s410_s3 + $0x18] sm:$0xff] }
  0x14   :  { %67 = vmatpush.msra.mxu0 %v32_v20  ;;  %v24_v34 = vld [vmem:[%s407_s0] sm:$0xff]  ;;  %v25_v35 = vld [vmem:[%s407_s0 + $0x8] sm:$0xff]  ;;  %v102_v39 = vld [vmem:[%s410_s3 + $0x10] sm:$0xff] }
  0x15   :  { %87 = vmatpush.msra.mxu1 %v48_v21  ;;  %v105_v36 = vld [vmem:[%s410_s3 + $0x28] sm:$0xff]  ;;  %v104_v37 = vld [vmem:[%s410_s3 + $0x20] sm:$0xff] }
  0x16   :  { %68 = vmatpush.msra.mxu0 %v31_v22  ;;  %126 = vmatpush.msra.mxu2 %v105_v36  ;;  %v101_v40 = vld [vmem:[%s410_s3 + $0x8] sm:$0xff]  ;;  %v100_v41 = vld [vmem:[%s410_s3] sm:$0xff] }
  0x17   :  { %88 = vmatpush.msra.mxu1 %v47_v23  ;;  %v139_v42 = vld [vmem:[%s408_s1] sm:$0xff]  ;;  %s232_s1 = smov 8  }
  0x18   :  { %69 = vmatpush.msra.mxu0 %v30_v24  ;;  %127 = vmatpush.msra.mxu2 %v104_v37  ;;  %v146_v49 = vld [vmem:[%s412_s5] sm:$0xff]  ;;  %s183_s5 = sshll.u32 %s233_s12, 4  ;;  %s184_s5 = int_to_ptr.vmem [resolvable:$true] %s183_s5 }
  0x19   :  { %89 = vmatpush.msra.mxu1 %v46_v25  ;;  %142 = vperm.xlu0 %199, %v139_v42   ;;  %v200_v50 = vld [vmem:[%s411_s4] ss:$0 sm:$0xff] }
  0x1a   :  { %70 = vmatpush.msra.mxu0 %v29_v26  ;;  %128 = vmatpush.msra.mxu2 %v103_v38 }
  0x1b   :  { %90 = vmatpush.msra.mxu1 %v45_v27  ;;  %166 = vmatpush.msra.mxu3 %v146_v49 }
  0x1c   :  { %71 = vmatpush.msra.mxu0 %v28_v28  ;;  %129 = vmatpush.msra.mxu2 %v102_v39 }
  0x1d   :  { %91 = vmatpush.msra.mxu1 %v44_v29 }
  0x1e   :  { %72 = vmatpush.msra.mxu0 %v27_v30  ;;  %130 = vmatpush.msra.mxu2 %v101_v40 }
  0x1f   :  { %92 = vmatpush.msra.mxu1 %v43_v31 }
  0x20   :  { %73 = vmatpush.msra.mxu0 %v26_v32  ;;  %131 = vmatpush.msra.mxu2 %v100_v41 }
  0x21   :  { %93 = vmatpush.msra.mxu1 %v42_v33  ;;  %74 = vmatmul.f32.vlgmr.msra.gmra.mxu0 %v24_v34 }
  0x22   :  { %94 = vmatmul.f32.vlgmr.msra.gmra.mxu1 %v25_v35 }
  0x8b   :  { %v143_v55 = vpop.permute.xlu0 %142 }
  0x9e   :  { %v75_v44 = vpop.f32.mrf.mxu0 }
  0x9f   :  { %v95_v45 = vpop.f32.mrf.mxu1 }
  0xa0   :  { %v96_v46 = vadd.f32 %v95_v45, %v75_v44 }
  0xa2   :  { %201 = vtanh.f32 %v96_v46 }
  0xa8   :  { %v202_v47 = vpop.eup %201 }
  0xa9   :  { %v99_v48 = vsub.f32 %v96_v46, %v202_v47 }
  0xab   :  { %194 = vmatmul.msk.f32.vlgmr.msra.gmra.mxu2 %vm112_vm0, %v99_v48 }
 0x12e   :  { %v133_v51 = vpop.f32.mrf.mxu2 }
 0x12f   :  { %v134_v52 = vadd.f32 %v200_v50, %v133_v51 }
 0x131   :  { %203 = vtanh.f32 %v134_v52 }
 0x137   :  { %v204_v53 = vpop.eup %203 }
 0x138   :  { %v137_v54 = vsub.f32 %v134_v52, %v204_v53 }
 0x13a   :  { %v138_v56 = vand.u32 2147483647, %v137_v54 }
 0x13c   :  { %v145_v57 = vmul.f32 %v143_v55, %v138_v56 }
 0x13e   :  { %195 = vmatmul.msk.f32.vlgmr.msra.gmra.mxu3 %vm147_vm1, %v145_v57 }
 0x1c1   :  { %v168_v58 = vpop.f32.mrf.mxu3 }
 0x1c2   :  { %172 = vrot.lane.b32.xlu0 %v168_v58, %s232_s1 }
 0x234   :  { %v173_v59 = vpop.permute.xlu0 %172 }
 0x235   :  { %v175_v60 = vsel %vm147_vm1, %v145_v57, %v173_v59 }
 0x236   :  { %177 = vst.msk [vmem:[#allocation2] sm:$0xff] %vm176_vm2, %v175_v60 }
 0x237   :  { %188 = dma.vmem_to_hbm [thread:$0]  %s184_s5, 128, %s186_s15, [#allocation3]  }
 0x238   :  { %229 = dma.done.wait [#allocation3], 128  }
 0x239   :  { %230 = vsyncadd [#allocation3], 4294967168 }
 0x23a   :  { %193 = vsyncpa [#allocation3], 1 }

</bundles_post_ra>
